<compile_context>
chip_gen: v7x
topology: tpu7x:2x2x1
jax: 0.10.0
libtpu: 0.0.40
codegen_flags: <defaults>
</compile_context>

<pallas_src>
import jax
import jax.numpy as jnp
from jax.experimental import pallas as pl
from jax.experimental.pallas import tpu as pltpu


# ---------------------------------------------------------------------------
# DDPM schedules (plain JAX glue, mirrors ddpm_schedules in the PyTorch code)
# ---------------------------------------------------------------------------
def ddpm_schedules(beta1, beta2, T):
    assert beta1 < beta2 < 1.0
    beta_t = (beta2 - beta1) * jnp.arange(0, T + 1, dtype=jnp.float32) / T + beta1
    sqrt_beta_t = jnp.sqrt(beta_t)
    alpha_t = 1.0 - beta_t
    log_alpha_t = jnp.log(alpha_t)
    alphabar_t = jnp.exp(jnp.cumsum(log_alpha_t, axis=0))
    sqrtab = jnp.sqrt(alphabar_t)
    oneover_sqrta = 1.0 / jnp.sqrt(alpha_t)
    sqrtmab = jnp.sqrt(1.0 - alphabar_t)
    mab_over_sqrtmab_inv = (1.0 - alpha_t) / sqrtmab
    return {
        "alpha_t": alpha_t,
        "oneover_sqrta": oneover_sqrta,
        "sqrt_beta_t": sqrt_beta_t,
        "alphabar_t": alphabar_t,
        "sqrtab": sqrtab,
        "sqrtmab": sqrtmab,
        "mab_over_sqrtmab": mab_over_sqrtmab_inv,
    }


# ---------------------------------------------------------------------------
# Pallas kernel: one sample per grid step.
#   x_t construction + denoiser + squared-error partial sum for this sample.
# Refs seen by the kernel (leading sample axis squeezed by BlockSpec):
#   x_ref, n_ref : (C, HW)  f32
#   sab_ref, smab_ref : (1, 1) f32     per-sample schedule scalars
#   bias_ref : (Hd, 1) f32             per-sample conditional bias
#   w1_ref : (Hd, C) bf16, w2_ref : (C, Hd) bf16
#   out_ref : (8, 128) f32             per-sample partial-sum tile
# ---------------------------------------------------------------------------
def ddpm_loss_kernel(x_ref, n_ref, sab_ref, smab_ref, bias_ref,
                     w1_ref, w2_ref, out_ref):
    x = x_ref[...]                     # (C, HW) f32
    noise = n_ref[...]                 # (C, HW) f32

    # x_t = sqrtab[t] * x + sqrtmab[t] * noise  (scalar broadcast, f32 VPU)
    x_t = sab_ref[...] * x + smab_ref[...] * noise                 # (C, HW)

    # denoiser: eps = W2 @ relu(W1 @ x_t + bias); bias broadcast along lanes.
    h = jnp.dot(w1_ref[...], x_t.astype(jnp.bfloat16),
                preferred_element_type=jnp.float32)                # (Hd, HW)
    h = jnp.maximum(h + bias_ref[...], 0.0)
    eps = jnp.dot(w2_ref[...], h.astype(jnp.bfloat16),
                  preferred_element_type=jnp.float32)              # (C, HW)

    # squared-error partial sum for this sample (f32 target, f32 accumulation),
    # written once to the whole lane-dense (8, 128) output tile.
    d = noise - eps
    out_ref[...] = jnp.full(out_ref.shape, jnp.sum(d * d), out_ref.dtype)


def ddpm_forward_loss(x, c, params, schedules, n_T, drop_prob, key):
    """x: (B, C, H, W) f32 NCHW, c: (B, Dc) f32. Returns scalar MSE loss."""
    B, C, H, W = x.shape
    HW = H * W
    Hd = params["w1"].shape[0]

    # ---- RNG / schedule gathers (plain JAX glue, mirrors torch RNG calls) ----
    k_t, k_noise, k_mask = jax.random.split(key, 3)
    _ts = jax.random.randint(k_t, (B,), 1, n_T + 1)                 # [1, n_T]
    # noise generated directly in the kernel-facing layout: no transpose pass.
    noise = jax.random.normal(k_noise, (B, C, HW), dtype=jnp.float32)
    context_mask = jax.random.bernoulli(k_mask, drop_prob, (B,)).astype(jnp.float32)

    # natural layout, free reshape of contiguous trailing dims (no data move)
    x3d = x.reshape(B, C, HW)

    # per-sample schedule scalars as (B, 1, 1) -- tiny, no lane expansion
    sab = schedules["sqrtab"][_ts].reshape(B, 1, 1).astype(jnp.float32)
    smab = schedules["sqrtmab"][_ts].reshape(B, 1, 1).astype(jnp.float32)

    # tiny per-sample conditional bias (Hd, B) -> (B, Hd, 1); broadcast along
    # the HW lanes happens inside the kernel, not via jnp.repeat in HBM.
    t_norm = _ts.astype(jnp.float32) / float(n_T)                   # (B,)
    keep = 1.0 - context_mask                                       # (B,)
    c_emb = params["wc"] @ c.T                                      # (Hd, B)
    bias_small = params["t_emb"] * t_norm[None, :] + keep[None, :] * c_emb
    bias3d = jnp.transpose(bias_small)[:, :, None]                  # (B, Hd, 1)

    grid_spec = pltpu.PrefetchScalarGridSpec(
        num_scalar_prefetch=0,
        grid=(B,),
        in_specs=[
            pl.BlockSpec((None, C, HW), lambda b: (b, 0, 0)),   # x      f32
            pl.BlockSpec((None, C, HW), lambda b: (b, 0, 0)),   # noise  f32
            pl.BlockSpec((None, 1, 1), lambda b: (b, 0, 0)),    # sqrtab[t]
            pl.BlockSpec((None, 1, 1), lambda b: (b, 0, 0)),    # sqrtmab[t]
            pl.BlockSpec((None, Hd, 1), lambda b: (b, 0, 0)),   # per-sample bias
            pl.BlockSpec((Hd, C), lambda b: (0, 0)),            # W1 bf16 (invariant)
            pl.BlockSpec((C, Hd), lambda b: (0, 0)),            # W2 bf16 (invariant)
        ],
        # (8, 128) tile per grid step: sublane dim is a multiple of 8, so the
        # store is unmasked and the grid split across blocks is legal.
        out_specs=pl.BlockSpec((8, 128), lambda b: (b, 0)),
    )

    partials = pl.pallas_call(
        ddpm_loss_kernel,
        out_shape=jax.ShapeDtypeStruct((B * 8, 128), jnp.float32),
        grid_spec=grid_spec,
        compiler_params=pltpu.CompilerParams(
            # each grid step writes its own output tile -> safe to shard the
            # sample axis across TensorCores on v7x; no-op on v5e/v6e.
            dimension_semantics=("parallel",)),
    )(x3d, noise, sab, smab, bias3d, params["w1"], params["w2"])

    # nn.MSELoss() default reduction='mean' over every element
    return jnp.sum(partials[0::8, 0]) / float(B * C * H * W)


# ---------------------------------------------------------------------------
# Deterministic parameter init + driver
# ---------------------------------------------------------------------------
def init_params(key, C, Hd, Dc):
    k1, k2, k3, k4 = jax.random.split(key, 4)
    return {
        # matmul weights stored bf16 (native MXU path on all generations)
        "w1": (jax.random.normal(k1, (Hd, C), jnp.float32) * 0.1).astype(jnp.bfloat16),
        "w2": (jax.random.normal(k4, (C, Hd), jnp.float32) * 0.1).astype(jnp.bfloat16),
        # tiny conditioning params stay f32 (used in the wrapper-side bias)
        "wc": jax.random.normal(k2, (Hd, Dc), jnp.float32) * 0.1,
        "t_emb": jax.random.normal(k3, (Hd, 1), jnp.float32) * 0.1,
    }


if __name__ == "__main__":
    B, C, H, W = 2, 4, 16, 16
    Dc, Hd = 8, 32
    n_T = 400
    beta1, beta2 = 1e-4, 0.02
    drop_prob = 0.1

    root = jax.random.PRNGKey(0)
    k_x, k_c, k_p, k_fwd = jax.random.split(root, 4)

    x = jax.random.normal(k_x, (B, C, H, W), jnp.float32)   # NCHW, like PyTorch
    c = jax.random.normal(k_c, (B, Dc), jnp.float32)

    params = init_params(k_p, C, Hd, Dc)
    schedules = ddpm_schedules(beta1, beta2, n_T)

    loss = ddpm_forward_loss(x, c, params, schedules, n_T, drop_prob, k_fwd)
    jax.block_until_ready(loss)
    assert loss.shape == () and bool(jnp.isfinite(loss))
    print("KERNEL_OK")
</pallas_src>

<mosaic_0001>
module attributes {stable_mosaic.version = 11 : i64} {
  func.func @ddpm_loss_kernel(%arg0: i32, %arg1: memref<1x4x256xf32, #tpu.memory_space<vmem>>, %arg2: memref<1x4x256xf32, #tpu.memory_space<vmem>>, %arg3: memref<1x1x1xf32, #tpu.memory_space<vmem>>, %arg4: memref<1x1x1xf32, #tpu.memory_space<vmem>>, %arg5: memref<1x32x1xf32, #tpu.memory_space<vmem>>, %arg6: memref<32x4xbf16, #tpu.memory_space<vmem>>, %arg7: memref<4x32xbf16, #tpu.memory_space<vmem>>, %arg8: memref<8x128xf32, #tpu.memory_space<vmem>>) attributes {dimension_semantics = [#tpu.dimension_semantics<parallel>], iteration_bounds = array<i64: 2>, scalar_prefetch = 0 : i64, scratch_operands = 0 : i64, tpu.core_type = #tpu.core_type<tc>, window_params = [{transform_indices = @transform_0, window_bounds = array<i64: 1, 4, 256>}, {transform_indices = @transform_1, window_bounds = array<i64: 1, 4, 256>}, {transform_indices = @transform_2, window_bounds = array<i64: 1, 1, 1>}, {transform_indices = @transform_3, window_bounds = array<i64: 1, 1, 1>}, {transform_indices = @transform_4, window_bounds = array<i64: 1, 32, 1>}, {pipeline_mode = #tpu.pipeline_mode<synchronous>, transform_indices = @transform_5, window_bounds = array<i64: 32, 4>}, {pipeline_mode = #tpu.pipeline_mode<synchronous>, transform_indices = @transform_6, window_bounds = array<i64: 4, 32>}, {transform_indices = @transform_7, window_bounds = array<i64: 8, 128>}]} {
    %c0 = arith.constant 0 : index
    %c0_0 = arith.constant 0 : index
    %c0_1 = arith.constant 0 : index
    %0 = vector.load %arg1[%c0, %c0_0, %c0_1] : memref<1x4x256xf32, #tpu.memory_space<vmem>>, vector<1x4x256xf32>
    %1 = vector.shape_cast %0 : vector<1x4x256xf32> to vector<4x256xf32>
    %c0_2 = arith.constant 0 : index
    %c0_3 = arith.constant 0 : index
    %c0_4 = arith.constant 0 : index
    %2 = vector.load %arg2[%c0_2, %c0_3, %c0_4] : memref<1x4x256xf32, #tpu.memory_space<vmem>>, vector<1x4x256xf32>
    %3 = vector.shape_cast %2 : vector<1x4x256xf32> to vector<4x256xf32>
    %c0_5 = arith.constant 0 : index
    %c0_6 = arith.constant 0 : index
    %c0_7 = arith.constant 0 : index
    %4 = vector.load %arg3[%c0_5, %c0_6, %c0_7] : memref<1x1x1xf32, #tpu.memory_space<vmem>>, vector<1x1x1xf32>
    %5 = vector.shape_cast %4 : vector<1x1x1xf32> to vector<1x1xf32>
    %6 = vector.broadcast %5 : vector<1x1xf32> to vector<4x256xf32>
    %7 = arith.mulf %6, %1 : vector<4x256xf32>
    %c0_8 = arith.constant 0 : index
    %c0_9 = arith.constant 0 : index
    %c0_10 = arith.constant 0 : index
    %8 = vector.load %arg4[%c0_8, %c0_9, %c0_10] : memref<1x1x1xf32, #tpu.memory_space<vmem>>, vector<1x1x1xf32>
    %9 = vector.shape_cast %8 : vector<1x1x1xf32> to vector<1x1xf32>
    %10 = vector.broadcast %9 : vector<1x1xf32> to vector<4x256xf32>
    %11 = arith.mulf %10, %3 : vector<4x256xf32>
    %12 = arith.addf %7, %11 : vector<4x256xf32>
    %c0_11 = arith.constant 0 : index
    %c0_12 = arith.constant 0 : index
    %13 = vector.load %arg6[%c0_11, %c0_12] : memref<32x4xbf16, #tpu.memory_space<vmem>>, vector<32x4xbf16>
    %14 = arith.truncf %12 : vector<4x256xf32> to vector<4x256xbf16>
    %cst = arith.constant dense<0.000000e+00> : vector<32x256xf32>
    %15 = tpu.matmul %13, %14, %cst {dimension_numbers = #tpu.dot_dimension_numbers<[1], [0], [0], [1], [0, 0, 1, 1], [], []>} : vector<32x4xbf16>, vector<4x256xbf16>, vector<32x256xf32> -> vector<32x256xf32>
    %c0_13 = arith.constant 0 : index
    %c0_14 = arith.constant 0 : index
    %c0_15 = arith.constant 0 : index
    %16 = vector.load %arg5[%c0_13, %c0_14, %c0_15] : memref<1x32x1xf32, #tpu.memory_space<vmem>>, vector<1x32x1xf32>
    %17 = vector.shape_cast %16 : vector<1x32x1xf32> to vector<32x1xf32>
    %18 = vector.broadcast %17 : vector<32x1xf32> to vector<32x256xf32>
    %19 = arith.addf %15, %18 : vector<32x256xf32>
    %cst_16 = arith.constant 0.000000e+00 : f32
    %20 = vector.broadcast %cst_16 : f32 to vector<32x256xf32>
    %21 = arith.maximumf %19, %20 : vector<32x256xf32>
    %c0_17 = arith.constant 0 : index
    %c0_18 = arith.constant 0 : index
    %22 = vector.load %arg7[%c0_17, %c0_18] : memref<4x32xbf16, #tpu.memory_space<vmem>>, vector<4x32xbf16>
    %23 = arith.truncf %21 : vector<32x256xf32> to vector<32x256xbf16>
    %cst_19 = arith.constant dense<0.000000e+00> : vector<4x256xf32>
    %24 = tpu.matmul %22, %23, %cst_19 {dimension_numbers = #tpu.dot_dimension_numbers<[1], [0], [0], [1], [0, 0, 1, 1], [], []>} : vector<4x32xbf16>, vector<32x256xbf16>, vector<4x256xf32> -> vector<4x256xf32>
    %25 = arith.subf %3, %24 : vector<4x256xf32>
    %26 = arith.mulf %25, %25 : vector<4x256xf32>
    %27 = vector.shape_cast %26 : vector<4x256xf32> to vector<1x4x256xf32>
    %cst_20 = arith.constant dense<0.000000e+00> : vector<1xf32>
    %28 = vector.multi_reduction <add>, %27, %cst_20 [1, 2] : vector<1x4x256xf32> to vector<1xf32>
    %29 = vector.shape_cast %28 : vector<1xf32> to vector<1x1x1xf32>
    %30 = vector.extract %29[0, 0, 0] : f32 from vector<1x1x1xf32>
    %31 = vector.broadcast %30 : f32 to vector<8x128xf32>
    %c0_21 = arith.constant 0 : index
    %c0_22 = arith.constant 0 : index
    %32 = vector.load %arg8[%c0_21, %c0_22] : memref<8x128xf32, #tpu.memory_space<vmem>>, vector<8x128xf32>
    tpu.vector_store %arg8[%c0_21, %c0_22], %31 {strides = array<i32>} : memref<8x128xf32, #tpu.memory_space<vmem>>, vector<8x128xf32>,
    return
  }
  func.func @transform_0(%arg0: i32) -> (i32, i32, i32) {
    %c0_i32 = arith.constant 0 : i32
    %c0_i32_0 = arith.constant 0 : i32
    %c0_i32_1 = arith.constant 0 : i32
    return %arg0, %c0_i32, %c0_i32_0 : i32, i32, i32
  }
  func.func @transform_1(%arg0: i32) -> (i32, i32, i32) {
    %c0_i32 = arith.constant 0 : i32
    %c0_i32_0 = arith.constant 0 : i32
    %c0_i32_1 = arith.constant 0 : i32
    return %arg0, %c0_i32, %c0_i32_0 : i32, i32, i32
  }
  func.func @transform_2(%arg0: i32) -> (i32, i32, i32) {
    %c0_i32 = arith.constant 0 : i32
    %c0_i32_0 = arith.constant 0 : i32
    %c0_i32_1 = arith.constant 0 : i32
    return %arg0, %c0_i32, %c0_i32_0 : i32, i32, i32
  }
  func.func @transform_3(%arg0: i32) -> (i32, i32, i32) {
    %c0_i32 = arith.constant 0 : i32
    %c0_i32_0 = arith.constant 0 : i32
    %c0_i32_1 = arith.constant 0 : i32
    return %arg0, %c0_i32, %c0_i32_0 : i32, i32, i32
  }
  func.func @transform_4(%arg0: i32) -> (i32, i32, i32) {
    %c0_i32 = arith.constant 0 : i32
    %c0_i32_0 = arith.constant 0 : i32
    %c0_i32_1 = arith.constant 0 : i32
    return %arg0, %c0_i32, %c0_i32_0 : i32, i32, i32
  }
  func.func @transform_5(%arg0: i32) -> (i32, i32) {
    %c0_i32 = arith.constant 0 : i32
    %c0_i32_0 = arith.constant 0 : i32
    %c0_i32_1 = arith.constant 0 : i32
    return %c0_i32, %c0_i32_0 : i32, i32
  }
  func.func @transform_6(%arg0: i32) -> (i32, i32) {
    %c0_i32 = arith.constant 0 : i32
    %c0_i32_0 = arith.constant 0 : i32
    %c0_i32_1 = arith.constant 0 : i32
    return %c0_i32, %c0_i32_0 : i32, i32
  }
  func.func @transform_7(%arg0: i32) -> (i32, i32) {
    %c0_i32 = arith.constant 0 : i32
    %c0_i32_0 = arith.constant 0 : i32
    return %arg0, %c0_i32 : i32, i32
  }
}

</mosaic_0001>

<bundles_post_ra>
// kernel: tpu_custom_call.1
= control target key start
LH: loop header
LB: loop body
LE: loop exit
PB: predicated region body
PF: predicated region fallthrough
CT: control target
= control target key end

     0   :  { %12 = vsyncpa [#allocation3], 0  ;;  %s977_s0 = inlined_call_operand.vmem [shape: f32[2,4,256], index: 0, kind: input, shape index: {}]   ;;  %s978_s1 = inlined_call_operand.vmem [shape: f32[2,4,256], index: 1, kind: input, shape index: {}]   ;;  %s979_s2 = inlined_call_operand.vmem [shape: f32[2,1,1], index: 2, kind: input, shape index: {}]   ;;  %s980_s3 = inlined_call_operand.vmem [shape: f32[2,1,1], index: 3, kind: input, shape index: {}]   ;;  %s981_s4 = inlined_call_operand.vmem [shape: f32[2,32,1], index: 4, kind: input, shape index: {}]   ;;  %s982_s5 = inlined_call_operand.vmem [shape: bf16[32,4], index: 5, kind: input, shape index: {}]   ;;  %s983_s6 = inlined_call_operand.vmem [shape: bf16[4,32], index: 6, kind: input, shape index: {}]   ;;  %s984_s7 = inlined_call_operand.hbm [shape: f32[16,128], index: 7, kind: output, shape index: {}]  }
   0x1   :  { %14 = vsyncpa [#allocation3 + $0x1], 0  ;;  %s856_s24 = smov 0   ;;  %s858_s25 = smov 0  }
   0x2   :  { %s860_s26 = smov 0   ;;  %s862_s27 = smov 0  }
   0x3 LB: > { %s877_s28 = sadd.s32 4294967295, %s812_s27   ;;  %s678_s29 = sadd.s32 4294967294, %s812_s27   ;;  %s812_s27 = sphi %s862_s27, %s990_s27   ;;  %s808_s26 = sphi %s860_s26, %s989_s26   ;;  %s804_s25 = sphi %s858_s25, %s988_s25   ;;  %s800_s24 = sphi %s856_s24, %s987_s24  }
   0x4   : > { %s881_s30 = sadd.s32 1, %s812_s27   ;;  %s199_s8 = sadd.s32 1, %s808_s26 }
   0x5   : > { %s196_s9 = ssub.s32 %s812_s27, %s881_s30  ;;  %p209_p0 = scmp.ne.s32.totalorder %s808_s26, %s804_s25 }
   0x6   : > { %p197_p1 = scmp.eq.s32.totalorder %s196_s9, 0  ;;  %p210_p2 = scmp.eq.s32.totalorder %s877_s28, 1 }
   0x7   : > { %p215_p3 = scmp.ne.s32.totalorder %s804_s25, %s800_s24  ;;  %p216_p4 = scmp.eq.s32.totalorder %s678_s29, 1 }
   0x8   : > { %s892_s10 = scalar_select %p197_p1, %s808_s26, %s199_s8  }
   0x9   : > { %p894_p5 = por %p210_p2, %p209_p0  ;;  %p898_p6 = por %p216_p4, %p215_p3 }
   0xa   : > { %p681_p7 = scmp.ge.s32.totalorder %s812_s27, 1  ;;  %p276_p8 = scmp.lt.s32.totalorder %s812_s27, 3 }
   0xc   : > { %p277_p9 = pnand %p681_p7, %p276_p8 }
   0xd   : > { %p324_p10 = scmp.lt.s32.totalorder (!%p277_p9), %s877_s28, 1  ;;  %v814_v0 = vmov (!%p277_p9), 0   ;;  %vm421_vm0 = vcmask (!%p277_p9), 1041408   ;;  %v748_v18 = vld [vmem:[%s982_s5] sm:$0xff] (!%p277_p9)   ;;  %vm414_vm1 = vcmask (!%p277_p9), 31744   ;;  %v749_v19 = vld [vmem:[%s982_s5 + $0x8] sm:$0xff] (!%p277_p9)  }
   0xe   : > { %280 = sbr.rel (%p277_p9) target bundleno = 845 (0x34d), region = 48  ;;  %746 = vset.pattern.permute.xlu0 (!%p277_p9), %v814_v0  ;;  %460 = vmatprep.mubr.bf16.mxu0 (!%p277_p9), %v814_v0  ;;  %v489_v52 = vld [vmem:[%s983_s6] sm:$0x3] (!%p277_p9)  ;;  %vm494_vm2 = vcmask (!%p277_p9), 261120   ;;  %vm548_vm3 = vcmask (!%p277_p9), 1043456  }
   0xf   : > { %747 = vset.pattern.permute.xlu1 (!%p277_p9), %v814_v0  ;;  %530 = vmatprep.mubr.bf16.mxu1 (!%p277_p9), %v814_v0 }
  0x15   : > { %s325_s13 = scalar_select %p324_p10, %s877_s28, 1 }
  0x17   : > { %s336_s16 = scalar_lea.vmem %s979_s2, %s325_s13  ;;  %s339_s19 = scalar_lea.vmem %s980_s3, %s325_s13 }
  0x18   : > { %v689_v1 = vld [vmem:[%s336_s16] ss:$0 sm:$0xff]  ;;  %s703_s20 = sshll.u32 %s325_s13, 5  ;;  %s701_s29 = sshll.u32 %s325_s13, 3 }
  0x19   : > { %355 = vperm.xlu0 %746, %v689_v1   ;;  %v690_v2 = vld [vmem:[%s339_s19] ss:$0 sm:$0xff]  ;;  %s344_s23 = scalar_lea.vmem %s981_s4, %s703_s20  ;;  %s328_s14 = scalar_lea.vmem %s977_s0, %s701_s29 }
  0x1a   : > { %v382_v3 = vld [vmem:[%s344_s23 + $0x10] sm:$0xff]  ;;  %v380_v4 = vld [vmem:[%s344_s23] sm:$0xff]  ;;  %v381_v5 = vld [vmem:[%s344_s23 + $0x8] sm:$0xff]  ;;  %s333_s17 = scalar_lea.vmem %s978_s1, %s701_s29 }
  0x1b   : > { %386 = vperm.xlu1 %747, %v380_v4   ;;  %v383_v6 = vld [vmem:[%s344_s23 + $0x18] sm:$0xff]  ;;  %v346_v8 = vld [vmem:[%s328_s14] sm:$0xff]  ;;  %s321_s23 = sand.u32 1, %s804_s25   ;;  %s698_s14 = sshll.u32 %s877_s28, 7 }
  0x1c   : > { %v347_v9 = vld [vmem:[%s333_s17] sm:$0xff]  ;;  %s682_s29 = sshll.u32 %s321_s23, 3  ;;  %s937_s13 = scalar_lea.hbm %s984_s7, %s698_s14 }
  0x1d   : > { %366 = vperm.xlu0 %746, %v690_v2   ;;  %s323_s8 = scalar_lea.vmem [#allocation2], %s682_s29  ;;  %s564_s18 = scalar_lea.sflag [#allocation3], %s321_s23 }
  0x1e   : > { %s577_s9 = sshll.u32 %s323_s8, 4  ;;  %s815_s28 = smov [#allocation2]   ;;  %s932_s9 = int_to_ptr.vmem [resolvable:$true] %s577_s9 }
  0x1f   : > { %391 = vperm.xlu1 %747, %v381_v5   ;;  %s750_s19 = scalar_lea.vmem %s932_s9, 128  ;;  %s754_s20 = sshll.u32 %s815_s28, 4  ;;  %s755_s20 = int_to_ptr.vmem [resolvable:$false] %s754_s20 }
  0x20   : > { %p751_p11 = scmp.ne.s32.totalorder %s932_s9, %s750_s19  ;;  %s756_s21 = scalar_lea.vmem %s755_s20, 256 }
  0x21   : > { %396 = vperm.xlu0 %746, %v382_v3   ;;  %p757_p0 = scmp.lt.s32.totalorder %s932_s9, %s755_s20  ;;  %p758_p1 = scmp.lt.s32.totalorder %s756_s21, %s750_s19 }
  0x22   : > { %p752_p12 = pnand %p751_p11, %p894_p5 }
  0x23   : > { %401 = vperm.xlu1 %747, %v383_v6   ;;  %p759_p2 = por %p758_p1, %p757_p0 }
  0x24   : > { %p753_p13 = pneg %p752_p12 }
  0x26   : > { %p760_p3 = pnand %p759_p2, %p753_p13 }
  0x98   : > { %v356_v7 = vpop.permute.xlu0 %355 }
  0x99   : > { %v358_v11 = vmul.f32 %v356_v7, %v346_v8 }
  0x9a   : > { %v387_v20 = vpop.permute.xlu1 %386 }
  0x9c   : > { %v367_v10 = vpop.permute.xlu0 %366 }
  0x9d   : > { %v369_v12 = vmul.f32 %v367_v10, %v347_v9 }
  0x9e   : > { %v392_v24 = vpop.permute.xlu1 %391 }
  0x9f   : > { %v370_v13 = vadd.f32 %v369_v12, %v358_v11 }
  0xa0   : > { %v397_v35 = vpop.permute.xlu0 %396 }
  0xa1   : > { %v376_v14 = vcombine.high %v370_v13, %v370_v13  ;;  %v378_v15 = vpack.c.bf16 %v370_v13, %v370_v13 }
  0xa2   : > { %v402_v40 = vpop.permute.xlu1 %401 }
  0xa3   : > { %v379_v16 = vpack.c.bf16 %v376_v14, %v376_v14  ;;  %v423_v17 = vsel %vm421_vm0, %v378_v15, 0 }
  0xa5   : > { %693 = vmatprep.subr.msk.bf16.mxu0 %vm421_vm0, %v379_v16 }
  0xa6   : > { %429 = vmatpush1.bf16.msra.mxu0 %v423_v17 }
  0xa9   : > { %694 = vmatmul.mubr.msk.bf16.vlgmr.msra.gmra.mrb[0].mxu0 %vm414_vm1, %v748_v18 }
  0xaa   : > { %470 = vmatprep.mubr.bf16.mxu0 %v814_v0 }
  0xb1   : > { %695 = vmatmul.mubr.msk.bf16.gmra.mrb[4].mxu0 %vm414_vm1, %v749_v19 }
 0x17c   : > { %v462_v21 = vpop.f32.mrb[0].mxu0 }
 0x17d   : > { %v463_v22 = vadd.f32 %v462_v21, %v387_v20  ;;  %v464_v23 = vpop.f32.mrb[1].mxu0 }
 0x17e   : > { %v465_v25 = vadd.f32 %v464_v23, %v387_v20  ;;  %v466_v26 = vpop.f32.mrb[2].mxu0 }
 0x17f   : > { %v467_v27 = vadd.f32 %v466_v26, %v392_v24  ;;  %v468_v28 = vpop.f32.mrb[3].mxu0  ;;  %v481_v30 = vmax.f32 %v463_v22, 0.0 }
 0x180   : > { %v469_v29 = vadd.f32 %v468_v28, %v392_v24  ;;  %v482_v32 = vmax.f32 %v465_v25, 0.0 }
 0x181   : > { %v483_v31 = vmax.f32 %v467_v27, 0.0 }
 0x182   : > { %v484_v33 = vmax.f32 %v469_v29, 0.0 }
 0x183   : > { %v490_v34 = vpack.c.bf16 %v483_v31, %v481_v30 }
 0x184   : > { %v472_v36 = vpop.f32.mrb[4].mxu0  ;;  %v491_v37 = vpack.c.bf16 %v484_v33, %v482_v32 }
 0x185   : > { %v473_v38 = vadd.f32 %v472_v36, %v397_v35  ;;  %v474_v39 = vpop.f32.mrb[5].mxu0 }
 0x186   : > { %v475_v41 = vadd.f32 %v474_v39, %v397_v35  ;;  %v476_v42 = vpop.f32.mrb[6].mxu0  ;;  %498 = vmatprep.subr.bf16.mxu1 %v491_v37 }
 0x187   : > { %v477_v43 = vadd.f32 %v476_v42, %v402_v40  ;;  %v478_v44 = vpop.f32.mrb[7].mxu0  ;;  %499 = vmatpush1.bf16.msra.mxu1 %v490_v34  ;;  %v485_v46 = vmax.f32 %v473_v38, 0.0 }
 0x188   : > { %v479_v45 = vadd.f32 %v478_v44, %v402_v40  ;;  %v486_v48 = vmax.f32 %v475_v41, 0.0 }
 0x189   : > { %v487_v47 = vmax.f32 %v477_v43, 0.0 }
 0x18a   : > { %v488_v49 = vmax.f32 %v479_v45, 0.0 }
 0x18b   : > { %v492_v50 = vpack.c.bf16 %v487_v47, %v485_v46 }
 0x18c   : > { %v493_v51 = vpack.c.bf16 %v488_v49, %v486_v48 }
 0x18e   : > { %500 = vmatprep.subr.bf16.mxu1 %v493_v51 }
 0x18f   : > { %501 = vmatpush1.bf16.msra.mxu1 %v492_v50 }
 0x192   : > { %696 = vmatmul.mubr.msk.bf16.vlgmr.msra.gmra.mrb[0].mxu1 %vm494_vm2, %v489_v52 }
 0x265   : > { %v532_v53 = vpop.f32.mrb[0].mxu1 }
 0x266   : > { %v534_v54 = vpop.f32.mrb[1].mxu1 }
 0x267   : > { %v541_v55 = vcombine.low %v532_v53, %v534_v54  ;;  %v536_v56 = vpop.f32.mrb[2].mxu1 }
 0x268   : > { %v537_v57 = vpop.f32.mrb[3].mxu1 }
 0x269   : > { %v543_v58 = vsub.f32 %v347_v9, %v541_v55 }
 0x26b   : > { %v544_v59 = vmul.f32 %v543_v58, %v543_v58 }
 0x26d   : > { %v546_v60 = vcombine.high %v544_v59, %v544_v59  ;;  %v549_v61 = vsel %vm548_vm3, %v544_v59, 0.0 }
 0x26f   : > { %v550_v62 = vsel %vm548_vm3, %v546_v60, 0.0 }
 0x270   : > { %v551_v63 = vadd.f32 %v550_v62, %v549_v61 }
 0x272   : > { %552 = vadd.xlane.f32.xlu0 %v551_v63 }
 0x2ff   : > { %v553_v0 = vpop.xlane.xlu0 %552 }
 0x300   : > { %v554_v1 = vrot.slane %v553_v0, 4 }
 0x302   : > { %v555_v2 = vadd.f32 %v554_v1, %v553_v0 }
 0x304   : > { %v556_v3 = vrot.slane %v555_v2, 2 }
 0x306   : > { %v557_v4 = vadd.f32 %v556_v3, %v555_v2 }
 0x308   : > { %v558_v5 = vrot.slane %v557_v4, 1 }
 0x30a   : > { %v559_v6 = vadd.f32 %v558_v5, %v557_v4 }
 0x30c   : > { %704 = vpush %v559_v6 }
 0x33d   : > { %s705_s15 = spop %704 }
 0x33e   : > { %v561_v7 = vstv %s705_s15 }
 0x33f   : > { %562 = vst [vmem:[%s323_s8] sm:$0xff] %v561_v7 }
 0x340   : > { %763 = shalt.err (!%p760_p3)
}
 0x341   : > { %s764_s22 = scalar_lea.hbm %s937_s13, 128  ;;  %s768_s8 = scalar_lea.hbm %s984_s7, 256 }
 0x342   : > { %p765_p4 = scmp.ne.s32.totalorder %s937_s13, %s764_s22  ;;  %p769_p9 = scmp.lt.u32.totalorder %s937_s13, %s984_s7 }
 0x343   : > { %p770_p10 = scmp.lt.u32.totalorder %s768_s8, %s764_s22  ;;  %p772_p12 = scmp.lt.u32.totalorder %s764_s22, %s937_s13 }
 0x344   : > { %p766_p7 = pnand %p765_p4, %p894_p5 }
 0x345   : > { %p771_p11 = por %p770_p10, %p769_p9 }
 0x346   : > { %p767_p8 = pneg %p766_p7 }
 0x347   : > { %p773_p13 = por %p772_p12, %p771_p11 }
 0x349   : > { %p774_p0 = pnand %p773_p13, %p767_p8 }
 0x34b   : > { %777 = shalt.err (!%p774_p0)
}
 0x34c   : > { %706 = dma.vmem_to_hbm [thread:$0]  (%p894_p5), %s932_s9, 128, %s937_s13, %s564_s18  }
 0x34d PF: > { %p712_p1 = scmp.ge.s32.totalorder %s812_s27, 2  ;;  %s589_s16 = sand.u32 1, %s800_s24  }
 0x34e   : > { %s590_s17 = scalar_lea.sflag [#allocation3], %s589_s16 }
 0x34f   : > { %p709_p2 = pnand %p712_p1, %p898_p6 }
 0x351   : > { %795 = dma.done.wait (!%p709_p2), %s590_s17, 128  }
 0x352   : > { %797 = vsyncadd (!%p709_p2), %s590_s17, 4294967168  ;;  %p17_p3 = scmp.ge.s32.totalorder %s881_s30, 4   ;;  %s987_s24 = smov %s804_s25 }
 0x353   : > { %s988_s25 = smov %s808_s26  ;;  %s989_s26 = smov %s892_s10 }
 0x354   : > { %s990_s27 = smov %s881_s30  ;;  %19 = sbr.rel (!%p17_p3) target bundleno = 3 (0x3), region = 95 }
 0x35b   :  { %595 = vsyncpa [#allocation3], 1 }
 0x35c   :  { %597 = vsyncpa [#allocation3 + $0x1], 1 }

</bundles_post_ra>
